<compile_context>
chip_gen: v7x
topology: tpu7x:2x2x1
jax: 0.10.0
libtpu: 0.0.40
codegen_flags: <defaults>
</compile_context>

<pallas_src>
import functools

import jax
import jax.numpy as jnp
from jax import lax
from jax.experimental import pallas as pl
from jax.experimental.pallas import tpu as pltpu


# ----------------------------------------------------------------------------
# Fused Pallas kernel: tiled matmul + folded BN scale/bias + SiLU (+ residual)
# ----------------------------------------------------------------------------
def _mm_bn_silu_kernel(*refs, act, has_res):
    if has_res:
        x_ref, w_ref, s_ref, b_ref, r_ref, o_ref, acc_ref = refs
    else:
        x_ref, w_ref, s_ref, b_ref, o_ref, acc_ref = refs
        r_ref = None

    kstep = pl.program_id(2)

    @pl.when(kstep == 0)
    def _init():
        acc_ref[...] = jnp.zeros_like(acc_ref)

    acc_ref[...] += jnp.dot(x_ref[...], w_ref[...],
                            preferred_element_type=jnp.float32)

    @pl.when(kstep == pl.num_programs(2) - 1)
    def _epilogue():
        y = acc_ref[...] * s_ref[...] + b_ref[...]      # folded BatchNorm
        if act:                                         # static python bool
            y = y * jax.nn.sigmoid(y)                   # fused SiLU
        if has_res:                                     # fused shortcut add
            y = y + r_ref[...].astype(jnp.float32)
        o_ref[...] = y.astype(o_ref.dtype)


def _round_up(v, m):
    return ((v + m - 1) // m) * m


def _pad_axis(a, axis, new_size):
    if a.shape[axis] == new_size:
        return a
    widths = [(0, 0)] * a.ndim
    widths[axis] = (0, new_size - a.shape[axis])
    return jnp.pad(a, widths)


def pallas_matmul_bn_act(x, w, scale, bias, act, res=None):
    """out = act((x @ w) * scale + bias) [+ res]; act == SiLU when `act`."""
    M, K = x.shape
    _, N = w.shape

    # ---- tile selection (pad only when the shape does not already align) ---
    if M <= 256:
        tm = _round_up(M, 8)
        Mp = tm
    else:
        tm = 256
        Mp = _round_up(M, tm)
    Kp = _round_up(K, 128)            # contraction dim lane-aligned (zero-fill)
    if Kp <= 1536:
        tk = Kp                       # single K block; fits VMEM comfortably
    else:
        tk = 512
        Kp = _round_up(K, tk)
    if N <= 256:
        tn, Np = N, N                 # full-dim N block: no output padding
    else:
        tn = 256
        Np = _round_up(N, tn)

    xp = _pad_axis(_pad_axis(x, 0, Mp), 1, Kp)
    wp = _pad_axis(_pad_axis(w, 0, Kp), 1, Np)
    sp = _pad_axis(scale.astype(jnp.float32), 0, Np).reshape(1, Np)
    bp = _pad_axis(bias.astype(jnp.float32), 0, Np).reshape(1, Np)

    inputs = [xp, wp, sp, bp]
    in_specs = [
        pl.BlockSpec((tm, tk), lambda i, j, k: (i, k)),
        pl.BlockSpec((tk, tn), lambda i, j, k: (k, j)),
        pl.BlockSpec((1, tn), lambda i, j, k: (0, j)),
        pl.BlockSpec((1, tn), lambda i, j, k: (0, j)),
    ]
    has_res = res is not None
    if has_res:
        rp = _pad_axis(_pad_axis(res, 0, Mp), 1, Np)
        inputs.append(rp)
        in_specs.append(pl.BlockSpec((tm, tn), lambda i, j, k: (i, j)))

    grid = (Mp // tm, Np // tn, Kp // tk)

    out = pl.pallas_call(
        functools.partial(_mm_bn_silu_kernel, act=bool(act), has_res=has_res),
        out_shape=jax.ShapeDtypeStruct((Mp, Np), x.dtype),
        grid_spec=pltpu.PrefetchScalarGridSpec(
            num_scalar_prefetch=0,
            grid=grid,
            in_specs=in_specs,
            out_specs=pl.BlockSpec((tm, tn), lambda i, j, k: (i, j)),
            scratch_shapes=[pltpu.VMEM((tm, tn), jnp.float32)],
        ),
        compiler_params=pltpu.CompilerParams(
            dimension_semantics=("parallel", "parallel", "arbitrary")),
    )(*inputs)

    if (Mp, Np) != (M, N):
        out = out[:M, :N]
    return out


def ref_matmul_bn_act(x, w, scale, bias, act, res=None):
    """Plain-JAX reference with identical wiring (verification only)."""
    y = jnp.dot(x, w, precision=lax.Precision.HIGHEST)
    y = y * scale[None, :] + bias[None, :]
    if act:
        y = y * jax.nn.sigmoid(y)
    if res is not None:
        y = y + res
    return y


# ----------------------------------------------------------------------------
# Plain-JAX layout helpers (no clean Pallas win for these small data shuffles)
# ----------------------------------------------------------------------------
def _im2col_nhwc(x, k, s, p):
    """Conv patches; feature order (ki, kj, cin) matches the weight reshape."""
    B, H, W, C = x.shape
    if k == 1 and s == 1:
        return x.reshape(B * H * W, C), (B, H, W)
    if p > 0:
        x = jnp.pad(x, ((0, 0), (p, p), (p, p), (0, 0)))
    Hp, Wp = x.shape[1], x.shape[2]
    Ho = (Hp - k) // s + 1
    Wo = (Wp - k) // s + 1
    cols = []
    for ki in range(k):
        for kj in range(k):
            cols.append(lax.slice(
                x, (0, ki, kj, 0),
                (B, ki + (Ho - 1) * s + 1, kj + (Wo - 1) * s + 1, C),
                (1, s, s, 1)))
    patches = jnp.concatenate(cols, axis=-1)          # (B, Ho, Wo, k*k*C)
    return patches.reshape(B * Ho * Wo, k * k * C), (B, Ho, Wo)


def _maxpool_nhwc(x, k, s, p, ceil_mode=False):
    H, W = x.shape[1], x.shape[2]
    if ceil_mode:
        Ho = -(-(H + 2 * p - k) // s) + 1
        Wo = -(-(W + 2 * p - k) // s) + 1
        ph = max(0, (Ho - 1) * s + k - H - p)
        pw = max(0, (Wo - 1) * s + k - W - p)
    else:
        ph, pw = p, p
    return lax.reduce_window(
        x, jnp.array(-jnp.inf, x.dtype), lax.max,
        window_dimensions=(1, k, k, 1), window_strides=(1, s, s, 1),
        padding=((0, 0), (p, ph), (p, pw), (0, 0)))


def _upsample2_nhwc(x):
    return jnp.repeat(jnp.repeat(x, 2, axis=1), 2, axis=2)


# ----------------------------------------------------------------------------
# Parameter init (inference-mode: BatchNorm folded into scale/bias).
# NOTE: static config (k, s, act, add, pool sizes) lives alongside the weights
# but the whole params tree is CLOSED OVER by jit (never passed as a traced
# argument), so these stay concrete Python values.
# ----------------------------------------------------------------------------
class _KeyGen:
    def __init__(self, key):
        self._key = key
        self._i = 0

    def __call__(self):
        self._i += 1
        return jax.random.fold_in(self._key, self._i)


def _init_conv(kg, cin, cout, k=1, s=1, act=True):
    w = jax.random.normal(kg(), (k, k, cin, cout), jnp.float32)
    w = w * (1.0 / jnp.sqrt(float(cin * k * k)))
    scale = 1.0 + 0.1 * jax.random.normal(kg(), (cout,), jnp.float32)
    bias = 0.1 * jax.random.normal(kg(), (cout,), jnp.float32)
    return {"w": w, "scale": scale, "bias": bias, "k": k, "s": s, "act": act}


def _init_bottleneck(kg, cin, cout, shortcut=True, e=0.5):
    c_ = int(cin * e)
    return {"cv1": _init_conv(kg, cin, c_, 1, 1),
            "cv2": _init_conv(kg, c_, cout, 3, 1),
            "add": bool(shortcut and cin == cout)}


def _init_c3(kg, cin, cout, n=1, shortcut=True, e=0.5):
    c_ = int(cout * e)
    return {"cv1": _init_conv(kg, cin, c_, 1, 1),
            "cv2": _init_conv(kg, cin, c_, 1, 1),
            "cv3": _init_conv(kg, 2 * c_, cout, 1, 1),
            "m": [_init_bottleneck(kg, c_, c_, shortcut, e=1.0) for _ in range(n)]}


def _init_sppf(kg, cin, cout, k=(3, 5, 7)):
    c_ = cin // 2
    return {"cv1": _init_conv(kg, cin, c_, 1, 1),
            "cv2": _init_conv(kg, c_ * (len(k) + 1), cout, 1, 1),
            "k": tuple(k)}


def _init_stem(kg, c1, c2, k=3):
    return {"stem_1": _init_conv(kg, c1, c2, k, 2),
            "stem_2a": _init_conv(kg, c2, c2 // 2, 1, 1),
            "stem_2b": _init_conv(kg, c2 // 2, c2, 3, 2),
            "stem_3": _init_conv(kg, c2 * 2, c2, 1, 1)}


def _init_backbone(kg, bc, bd):
    return {
        "stem": _init_stem(kg, 3, bc, k=3),
        "dark2": {"c3": _init_c3(kg, bc, bc * 2, bd)},
        "dark3": {"conv": _init_conv(kg, bc * 2, bc * 4, 3, 2),
                  "c3": _init_c3(kg, bc * 4, bc * 4, bd * 3)},
        "dark4": {"conv": _init_conv(kg, bc * 4, bc * 8, 3, 2),
                  "c3": _init_c3(kg, bc * 8, bc * 8, bd * 3)},
        "dark5": {"conv": _init_conv(kg, bc * 8, bc * 16, 3, 2),
                  "sppf": _init_sppf(kg, bc * 16, bc * 16),
                  "c3": _init_c3(kg, bc * 16, bc * 16, bd, shortcut=False)},
    }


def _init_head(kg, cin, cout):
    w = jax.random.normal(kg(), (1, 1, cin, cout), jnp.float32) / jnp.sqrt(float(cin))
    b = 0.01 * jax.random.normal(kg(), (cout,), jnp.float32)
    return {"w": w, "b": b}


def init_yolo_params(kg, anchor_num, num_classes, point_num, wid_mul, dep_mul):
    bc = int(wid_mul * 64)
    bd = max(round(dep_mul * 3), 1)
    out_size = 5 + point_num * 2 + num_classes
    # NOTE: down_sample3 / conv3_for_down_sample3 exist in the torch module but
    # are never used in its forward(), so they are not instantiated here.
    return {
        "backbone": _init_backbone(kg, bc, bd),
        "conv_for_feat3": _init_conv(kg, bc * 16, bc * 8, 1, 1),
        "conv3_for_up_sample1": _init_c3(kg, bc * 16, bc * 8, bd, shortcut=False),
        "conv_for_feat2": _init_conv(kg, bc * 8, bc * 4, 1, 1),
        "conv3_for_up_sample2": _init_c3(kg, bc * 8, bc * 4, bd, shortcut=False),
        "down_sample1": _init_conv(kg, bc * 4, bc * 4, 3, 2),
        "conv3_for_down_sample1": _init_c3(kg, bc * 8, bc * 8, bd, shortcut=False),
        "down_sample2": _init_conv(kg, bc * 8, bc * 8, 3, 2),
        "conv3_for_down_sample2": _init_c3(kg, bc * 16, bc * 16, bd, shortcut=False),
        "yolo_head_P3": _init_head(kg, bc * 4, anchor_num * out_size),
        "yolo_head_P4": _init_head(kg, bc * 8, anchor_num * out_size),
        "yolo_head_P5": _init_head(kg, bc * 16, anchor_num * out_size),
    }


# ----------------------------------------------------------------------------
# Forward pass (structure mirrors the PyTorch module; `mm` is the fused kernel)
# ----------------------------------------------------------------------------
def fwd_conv(p, x, mm, res=None):
    k, s = p["k"], p["s"]
    cin = x.shape[-1]
    cout = p["w"].shape[-1]
    patches, (B, Ho, Wo) = _im2col_nhwc(x, k, s, k // 2)
    res2d = None if res is None else res.reshape(B * Ho * Wo, cout)
    y = mm(patches, p["w"].reshape(k * k * cin, cout), p["scale"], p["bias"],
           p["act"], res2d)
    return y.reshape(B, Ho, Wo, cout)


def fwd_bottleneck(p, x, mm):
    y1 = fwd_conv(p["cv1"], x, mm)
    if p["add"]:
        # residual add fused into the cv2 GEMM epilogue
        return fwd_conv(p["cv2"], y1, mm, res=x)
    return fwd_conv(p["cv2"], y1, mm)


def fwd_c3(p, x, mm):
    y1 = fwd_conv(p["cv1"], x, mm)
    for bp in p["m"]:
        y1 = fwd_bottleneck(bp, y1, mm)
    y2 = fwd_conv(p["cv2"], x, mm)
    return fwd_conv(p["cv3"], jnp.concatenate([y1, y2], axis=-1), mm)


def fwd_sppf(p, x, mm):
    x = fwd_conv(p["cv1"], x, mm)
    pools = [_maxpool_nhwc(x, k, 1, k // 2) for k in p["k"]]
    return fwd_conv(p["cv2"], jnp.concatenate([x] + pools, axis=-1), mm)


def fwd_stem(p, x, mm):
    s1 = fwd_conv(p["stem_1"], x, mm)
    s2b = fwd_conv(p["stem_2b"], fwd_conv(p["stem_2a"], s1, mm), mm)
    s2p = _maxpool_nhwc(s1, 2, 2, 0, ceil_mode=True)
    return fwd_conv(p["stem_3"], jnp.concatenate([s2b, s2p], axis=-1), mm)


def fwd_backbone(p, x, mm):
    x = fwd_stem(p["stem"], x, mm)
    x = fwd_c3(p["dark2"]["c3"], x, mm)
    x = fwd_c3(p["dark3"]["c3"], fwd_conv(p["dark3"]["conv"], x, mm), mm)
    feat1 = x
    x = fwd_c3(p["dark4"]["c3"], fwd_conv(p["dark4"]["conv"], x, mm), mm)
    feat2 = x
    x = fwd_conv(p["dark5"]["conv"], x, mm)
    x = fwd_sppf(p["dark5"]["sppf"], x, mm)
    feat3 = fwd_c3(p["dark5"]["c3"], x, mm)
    return feat1, feat2, feat3


def fwd_head(p, x, mm):
    # nn.Conv2d(cin, cout, 1) with bias, no BN, no activation.
    B, H, W, C = x.shape
    cout = p["w"].shape[-1]
    y = mm(x.reshape(B * H * W, C), p["w"].reshape(C, cout),
           jnp.ones((cout,), jnp.float32), p["b"], False)
    return y.reshape(B, H, W, cout)


def yolo_forward(params, x_nchw, mm):
    x = jnp.transpose(x_nchw, (0, 2, 3, 1))          # NCHW -> NHWC (lane-dense C)
    feat1, feat2, feat3 = fwd_backbone(params["backbone"], x, mm)

    p5 = fwd_conv(params["conv_for_feat3"], feat3, mm)
    p4 = jnp.concatenate([_upsample2_nhwc(p5), feat2], axis=-1)
    p4 = fwd_c3(params["conv3_for_up_sample1"], p4, mm)
    p4 = fwd_conv(params["conv_for_feat2"], p4, mm)
    p3 = jnp.concatenate([_upsample2_nhwc(p4), feat1], axis=-1)
    p3 = fwd_c3(params["conv3_for_up_sample2"], p3, mm)

    p3_down = fwd_conv(params["down_sample1"], p3, mm)
    p4 = jnp.concatenate([p3_down, p4], axis=-1)
    p4 = fwd_c3(params["conv3_for_down_sample1"], p4, mm)
    p4_down = fwd_conv(params["down_sample2"], p4, mm)
    p5 = jnp.concatenate([p4_down, p5], axis=-1)
    p5 = fwd_c3(params["conv3_for_down_sample2"], p5, mm)

    out2 = fwd_head(params["yolo_head_P3"], p3, mm)
    out1 = fwd_head(params["yolo_head_P4"], p4, mm)
    out0 = fwd_head(params["yolo_head_P5"], p5, mm)

    to_nchw = lambda t: jnp.transpose(t, (0, 3, 1, 2))
    return to_nchw(out0), to_nchw(out1), to_nchw(out2)


# ----------------------------------------------------------------------------
if __name__ == "__main__":
    root = jax.random.PRNGKey(0)
    kg = _KeyGen(root)
    anchor_num, num_classes, point_num = 3, 1, 5
    wid_mul, dep_mul = 0.25, 0.33                     # base_channels=16, depth=1
    params = init_yolo_params(kg, anchor_num, num_classes, point_num,
                              wid_mul, dep_mul)

    x = jax.random.normal(jax.random.fold_in(root, 10_000), (2, 3, 64, 64),
                          jnp.float32)

    # --- unit check: one fused Conv+BN+SiLU (Pallas GEMM) vs lax.conv ref ---
    cp = params["backbone"]["dark3"]["conv"]          # Conv(32, 64, k=3, s=2)
    xu = jax.random.normal(jax.random.fold_in(root, 10_001), (2, 16, 16, 32),
                           jnp.float32)
    y_pl = jax.block_until_ready(fwd_conv(cp, xu, pallas_matmul_bn_act))
    y_rf = lax.conv_general_dilated(
        xu, cp["w"], window_strides=(2, 2), padding=((1, 1), (1, 1)),
        dimension_numbers=("NHWC", "HWIO", "NHWC"),
        precision=lax.Precision.HIGHEST)
    y_rf = y_rf * cp["scale"] + cp["bias"]
    y_rf = y_rf * jax.nn.sigmoid(y_rf)
    assert y_pl.shape == y_rf.shape and y_pl.dtype == y_rf.dtype
    assert jnp.allclose(y_pl, y_rf, atol=5e-2, rtol=5e-2)

    # --- full forward: Pallas path vs plain-JAX reference path --------------
    # params (which carry static Python config like kernel size / stride) are
    # closed over, NOT passed as traced jit arguments -> no tracer bool errors.
    fwd_pl = jax.jit(lambda t: yolo_forward(params, t, pallas_matmul_bn_act))
    fwd_rf = jax.jit(lambda t: yolo_forward(params, t, ref_matmul_bn_act))
    out0, out1, out2 = jax.block_until_ready(fwd_pl(x))
    r0, r1, r2 = jax.block_until_ready(fwd_rf(x))

    n_out = anchor_num * (5 + point_num * 2 + num_classes)   # 48
    assert out0.shape == (2, n_out, 2, 2)
    assert out1.shape == (2, n_out, 4, 4)
    assert out2.shape == (2, n_out, 8, 8)
    for a, b in ((out0, r0), (out1, r1), (out2, r2)):
        assert bool(jnp.all(jnp.isfinite(a)))
        assert float(jnp.max(jnp.abs(a - b))) < 0.3

    print("KERNEL_OK")
</pallas_src>

<mosaic_0001>
module attributes {stable_mosaic.version = 11 : i64} {
  func.func @_mm_bn_silu_kernel(%arg0: i32, %arg1: i32, %arg2: i32, %arg3: memref<128x384xf32, #tpu.memory_space<vmem>>, %arg4: memref<384x64xf32, #tpu.memory_space<vmem>>, %arg5: memref<1x64xf32, #tpu.memory_space<vmem>>, %arg6: memref<1x64xf32, #tpu.memory_space<vmem>>, %arg7: memref<128x64xf32, #tpu.memory_space<vmem>>, %arg8: memref<128x64xf32, #tpu.memory_space<vmem>>) attributes {dimension_semantics = [#tpu.dimension_semantics<parallel>, #tpu.dimension_semantics<parallel>, #tpu.dimension_semantics<arbitrary>], iteration_bounds = array<i64: 1, 1, 1>, scalar_prefetch = 0 : i64, scratch_operands = 1 : i64, tpu.core_type = #tpu.core_type<tc>, window_params = [{transform_indices = @transform_0, window_bounds = array<i64: 128, 384>}, {transform_indices = @transform_1, window_bounds = array<i64: 384, 64>}, {transform_indices = @transform_2, window_bounds = array<i64: 1, 64>}, {transform_indices = @transform_3, window_bounds = array<i64: 1, 64>}, {transform_indices = @transform_4, window_bounds = array<i64: 128, 64>}]} {
    %c0_i32 = arith.constant 0 : i32
    %0 = arith.cmpi eq, %arg2, %c0_i32 : i32
    %1 = arith.extui %0 : i1 to i32
    %c0_i32_0 = arith.constant 0 : i32
    %2 = arith.cmpi ne, %1, %c0_i32_0 : i32
    scf.if %2 {
      %cst_10 = arith.constant 0.000000e+00 : f32
      %12 = vector.broadcast %cst_10 : f32 to vector<128x64xf32>
      %c0_11 = arith.constant 0 : index
      %c0_12 = arith.constant 0 : index
      %13 = vector.load %arg8[%c0_11, %c0_12] : memref<128x64xf32, #tpu.memory_space<vmem>>, vector<128x64xf32>
      tpu.vector_store %arg8[%c0_11, %c0_12], %12 {strides = array<i32>} : memref<128x64xf32, #tpu.memory_space<vmem>>, vector<128x64xf32>,
    } else {
    }
    %c0 = arith.constant 0 : index
    %c0_1 = arith.constant 0 : index
    %3 = vector.load %arg8[%c0, %c0_1] : memref<128x64xf32, #tpu.memory_space<vmem>>, vector<128x64xf32>
    %c0_2 = arith.constant 0 : index
    %c0_3 = arith.constant 0 : index
    %4 = vector.load %arg3[%c0_2, %c0_3] : memref<128x384xf32, #tpu.memory_space<vmem>>, vector<128x384xf32>
    %c0_4 = arith.constant 0 : index
    %c0_5 = arith.constant 0 : index
    %5 = vector.load %arg4[%c0_4, %c0_5] : memref<384x64xf32, #tpu.memory_space<vmem>>, vector<384x64xf32>
    %cst = arith.constant dense<0.000000e+00> : vector<128x64xf32>
    %6 = tpu.matmul %4, %5, %cst {dimension_numbers = #tpu.dot_dimension_numbers<[1], [0], [0], [1], [0, 0, 1, 1], [], []>} : vector<128x384xf32>, vector<384x64xf32>, vector<128x64xf32> -> vector<128x64xf32>
    %7 = arith.addf %3, %6 : vector<128x64xf32>
    %c0_6 = arith.constant 0 : index
    %c0_7 = arith.constant 0 : index
    %8 = vector.load %arg8[%c0_6, %c0_7] : memref<128x64xf32, #tpu.memory_space<vmem>>, vector<128x64xf32>
    tpu.vector_store %arg8[%c0_6, %c0_7], %7 {strides = array<i32>} : memref<128x64xf32, #tpu.memory_space<vmem>>, vector<128x64xf32>,
    %c0_i32_8 = arith.constant 0 : i32
    %9 = arith.cmpi eq, %arg2, %c0_i32_8 : i32
    %10 = arith.extui %9 : i1 to i32
    %c0_i32_9 = arith.constant 0 : i32
    %11 = arith.cmpi ne, %10, %c0_i32_9 : i32
    scf.if %11 {
      %c0_10 = arith.constant 0 : index
      %c0_11 = arith.constant 0 : index
      %12 = vector.load %arg8[%c0_10, %c0_11] : memref<128x64xf32, #tpu.memory_space<vmem>>, vector<128x64xf32>
      %c0_12 = arith.constant 0 : index
      %c0_13 = arith.constant 0 : index
      %13 = vector.load %arg5[%c0_12, %c0_13] : memref<1x64xf32, #tpu.memory_space<vmem>>, vector<1x64xf32>
      %14 = vector.broadcast %13 : vector<1x64xf32> to vector<128x64xf32>
      %15 = arith.mulf %12, %14 : vector<128x64xf32>
      %c0_14 = arith.constant 0 : index
      %c0_15 = arith.constant 0 : index
      %16 = vector.load %arg6[%c0_14, %c0_15] : memref<1x64xf32, #tpu.memory_space<vmem>>, vector<1x64xf32>
      %17 = vector.broadcast %16 : vector<1x64xf32> to vector<128x64xf32>
      %18 = arith.addf %15, %17 : vector<128x64xf32>
      %19 = arith.negf %18 : vector<128x64xf32>
      %20 = math.exp %19 : vector<128x64xf32>
      %cst_16 = arith.constant 1.000000e+00 : f32
      %21 = vector.broadcast %cst_16 : f32 to vector<128x64xf32>
      %22 = arith.addf %21, %20 : vector<128x64xf32>
      %23 = arith.divf %21, %22 : vector<128x64xf32>
      %24 = arith.mulf %18, %23 : vector<128x64xf32>
      %c0_17 = arith.constant 0 : index
      %c0_18 = arith.constant 0 : index
      %25 = vector.load %arg7[%c0_17, %c0_18] : memref<128x64xf32, #tpu.memory_space<vmem>>, vector<128x64xf32>
      tpu.vector_store %arg7[%c0_17, %c0_18], %24 {strides = array<i32>} : memref<128x64xf32, #tpu.memory_space<vmem>>, vector<128x64xf32>,
    } else {
    }
    return
  }
  func.func @transform_0(%arg0: i32, %arg1: i32, %arg2: i32) -> (i32, i32) {
    %c0_i32 = arith.constant 0 : i32
    return %arg0, %arg2 : i32, i32
  }
  func.func @transform_1(%arg0: i32, %arg1: i32, %arg2: i32) -> (i32, i32) {
    %c0_i32 = arith.constant 0 : i32
    return %arg2, %arg1 : i32, i32
  }
  func.func @transform_2(%arg0: i32, %arg1: i32, %arg2: i32) -> (i32, i32) {
    %c0_i32 = arith.constant 0 : i32
    %c0_i32_0 = arith.constant 0 : i32
    return %c0_i32, %arg1 : i32, i32
  }
  func.func @transform_3(%arg0: i32, %arg1: i32, %arg2: i32) -> (i32, i32) {
    %c0_i32 = arith.constant 0 : i32
    %c0_i32_0 = arith.constant 0 : i32
    return %c0_i32, %arg1 : i32, i32
  }
  func.func @transform_4(%arg0: i32, %arg1: i32, %arg2: i32) -> (i32, i32) {
    %c0_i32 = arith.constant 0 : i32
    return %arg0, %arg1 : i32, i32
  }
}

</mosaic_0001>

<bundles_post_ra>
// kernel: tpu_custom_call.1
= control target key start
LH: loop header
LB: loop body
LE: loop exit
PB: predicated region body
PF: predicated region fallthrough
CT: control target
= control target key end

     0   :  { %vm21_vm0 = vcmask 523264   ;;  %s1512_s1 = inlined_call_operand.vmem [shape: f32[384,64], index: 1, kind: input, shape index: {}]   ;;  %s1513_s0 = inlined_call_operand.vmem [shape: f32[128,384], index: 0, kind: input, shape index: {}]   ;;  %s1514_s2 = inlined_call_operand.vmem [shape: f32[1,64], index: 2, kind: input, shape index: {}]   ;;  %s1515_s3 = inlined_call_operand.vmem [shape: f32[1,64], index: 3, kind: input, shape index: {}]   ;;  %s1516_s4 = inlined_call_operand.vmem [shape: f32[128,64], index: 4, kind: output, shape index: {}]  }
   0x1   :  { %v118_v0 = vld [vmem:[%s1512_s1 + $0x80] sm:$0xff]  ;;  %v119_v1 = vld [vmem:[%s1512_s1 + $0x88] sm:$0xff]  ;;  %v120_v9 = vld [vmem:[%s1512_s1 + $0x90] sm:$0xff] }
   0x2   :  { %v102_v2 = vld [vmem:[%s1512_s1] sm:$0xff]  ;;  %v856_v3 = vpack.c.bf16 %v119_v1, %v118_v0  ;;  %v103_v4 = vld [vmem:[%s1512_s1 + $0x8] sm:$0xff]  ;;  %v121_v10 = vld [vmem:[%s1512_s1 + $0x98] sm:$0xff] }
   0x3   :  { %v134_v5 = vld [vmem:[%s1512_s1 + $0x100] sm:$0xff]  ;;  %v135_v6 = vld [vmem:[%s1512_s1 + $0x108] sm:$0xff]  ;;  %v858_v7 = vpack.c.bf16 %v103_v4, %v102_v2  ;;  %v104_v11 = vld [vmem:[%s1512_s1 + $0x10] sm:$0xff]  ;;  %v860_v12 = vpack.c.bf16 %v121_v10, %v120_v9 }
   0x4   :  { %v888_v8 = vpack.c.bf16 %v135_v6, %v134_v5  ;;  %857 = vmatprep.subr.bf16.mxu0 %v856_v3  ;;  %v105_v13 = vld [vmem:[%s1512_s1 + $0x18] sm:$0xff]  ;;  %v136_v14 = vld [vmem:[%s1512_s1 + $0x110] sm:$0xff]  ;;  %v122_v18 = vld [vmem:[%s1512_s1 + $0xa0] sm:$0xff] }
   0x5   :  { %v137_v15 = vld [vmem:[%s1512_s1 + $0x118] sm:$0xff]  ;;  %859 = vmatpush3.bf16.msra.mxu0 %v858_v7  ;;  %v862_v16 = vpack.c.bf16 %v105_v13, %v104_v11  ;;  %v123_v19 = vld [vmem:[%s1512_s1 + $0xa8] sm:$0xff]  ;;  %v106_v20 = vld [vmem:[%s1512_s1 + $0x20] sm:$0xff] }
   0x6   :  { %889 = vmatprep.subr.bf16.mxu1 %v888_v8  ;;  %v892_v17 = vpack.c.bf16 %v137_v15, %v136_v14  ;;  %861 = vmatprep.subr.bf16.mxu0 %v860_v12  ;;  %v864_v21 = vpack.c.bf16 %v123_v19, %v122_v18  ;;  %v107_v22 = vld [vmem:[%s1512_s1 + $0x28] sm:$0xff]  ;;  %v138_v23 = vld [vmem:[%s1512_s1 + $0x120] sm:$0xff]  ;;  %v124_v26 = vld [vmem:[%s1512_s1 + $0xb0] sm:$0xff] }
   0x7   :  { %891 = vmatpush3.bf16.msra.mxu1 %v888_v8  ;;  %v139_v24 = vld [vmem:[%s1512_s1 + $0x128] sm:$0xff]  ;;  %v125_v27 = vld [vmem:[%s1512_s1 + $0xb8] sm:$0xff]  ;;  %v140_v28 = vld [vmem:[%s1512_s1 + $0x130] sm:$0xff]  ;;  %v866_v30 = vpack.c.bf16 %v107_v22, %v106_v20 }
   0x8   :  { %893 = vmatprep.subr.bf16.mxu1 %v892_v17  ;;  %v896_v25 = vpack.c.bf16 %v139_v24, %v138_v23  ;;  %v141_v29 = vld [vmem:[%s1512_s1 + $0x138] sm:$0xff]  ;;  %v868_v31 = vpack.c.bf16 %v125_v27, %v124_v26  ;;  %v108_v32 = vld [vmem:[%s1512_s1 + $0x30] sm:$0xff]  ;;  %v126_v35 = vld [vmem:[%s1512_s1 + $0xc0] sm:$0xff] }
   0x9   :  { %863 = vmatpush3.bf16.msra.mxu0 %v862_v16  ;;  %v109_v33 = vld [vmem:[%s1512_s1 + $0x38] sm:$0xff]  ;;  %v900_v34 = vpack.c.bf16 %v141_v29, %v140_v28  ;;  %v127_v36 = vld [vmem:[%s1512_s1 + $0xc8] sm:$0xff]  ;;  %v142_v37 = vld [vmem:[%s1512_s1 + $0x140] sm:$0xff] }
   0xa   :  { %865 = vmatprep.subr.bf16.mxu0 %v864_v21  ;;  %v143_v38 = vld [vmem:[%s1512_s1 + $0x148] sm:$0xff]  ;;  %v870_v39 = vpack.c.bf16 %v109_v33, %v108_v32  ;;  %v872_v40 = vpack.c.bf16 %v127_v36, %v126_v35  ;;  %v110_v41 = vld [vmem:[%s1512_s1 + $0x40] sm:$0xff]  ;;  %v128_v44 = vld [vmem:[%s1512_s1 + $0xd0] sm:$0xff] }
   0xb   :  { %895 = vmatpush3.bf16.msra.mxu1 %v892_v17  ;;  %v111_v42 = vld [vmem:[%s1512_s1 + $0x48] sm:$0xff]  ;;  %v904_v43 = vpack.c.bf16 %v143_v38, %v142_v37  ;;  %v129_v45 = vld [vmem:[%s1512_s1 + $0xd8] sm:$0xff]  ;;  %v144_v46 = vld [vmem:[%s1512_s1 + $0x150] sm:$0xff] }
   0xc   :  { %897 = vmatprep.subr.bf16.mxu1 %v896_v25  ;;  %v145_v47 = vld [vmem:[%s1512_s1 + $0x158] sm:$0xff]  ;;  %v874_v48 = vpack.c.bf16 %v111_v42, %v110_v41  ;;  %v55_v49 = vld [vmem:[%s1513_s0 + $0x8] sm:$0xff]  ;;  %v56_v50 = vld [vmem:[%s1513_s0 + $0x10] sm:$0xff]  ;;  %v876_v51 = vpack.c.bf16 %v129_v45, %v128_v44 }
   0xd   :  { %867 = vmatpush3.bf16.msra.mxu0 %v866_v30  ;;  %v112_v52 = vld [vmem:[%s1512_s1 + $0x50] sm:$0xff]  ;;  %v113_v53 = vld [vmem:[%s1512_s1 + $0x58] sm:$0xff]  ;;  %v908_v54 = vpack.c.bf16 %v145_v47, %v144_v46  ;;  %v130_v55 = vld [vmem:[%s1512_s1 + $0xe0] sm:$0xff]  ;;  %214 = vmatprep.mubr.f32.mxu0 %v55_v49 }
   0xe   :  { %869 = vmatprep.subr.bf16.mxu0 %v868_v31  ;;  %v131_v56 = vld [vmem:[%s1512_s1 + $0xe8] sm:$0xff]  ;;  %v146_v57 = vld [vmem:[%s1512_s1 + $0x160] sm:$0xff]  ;;  %832 = vmatprep.mubr.f32.mxu1 %v56_v50  ;;  %v878_v59 = vpack.c.bf16 %v113_v53, %v112_v52  ;;  %v132_v0 = vld [vmem:[%s1512_s1 + $0xf0] sm:$0xff] }
   0xf   :  { %899 = vmatpush3.bf16.msra.mxu1 %v896_v25  ;;  %v147_v58 = vld [vmem:[%s1512_s1 + $0x168] sm:$0xff]  ;;  %v880_v60 = vpack.c.bf16 %v131_v56, %v130_v55  ;;  %v114_v61 = vld [vmem:[%s1512_s1 + $0x60] sm:$0xff]  ;;  %v133_v1 = vld [vmem:[%s1512_s1 + $0xf8] sm:$0xff]  ;;  %v985_v56 = vmov 0.0  }
  0x10   :  { %901 = vmatprep.subr.bf16.mxu1 %v900_v34  ;;  %v115_v62 = vld [vmem:[%s1512_s1 + $0x68] sm:$0xff]  ;;  %v912_v63 = vpack.c.bf16 %v147_v58, %v146_v57  ;;  %v148_v2 = vld [vmem:[%s1512_s1 + $0x170] sm:$0xff]  ;;  %v149_v3 = vld [vmem:[%s1512_s1 + $0x178] sm:$0xff]  ;;  %v884_v5 = vpack.c.bf16 %v133_v1, %v132_v0  ;;  %22 = vst.msk [vmem:[#allocation2] sm:$0xff] %vm21_vm0, %v985_v56 }
  0x11   :  { %871 = vmatpush3.bf16.msra.mxu0 %v870_v39  ;;  %v882_v4 = vpack.c.bf16 %v115_v62, %v114_v61  ;;  %v116_v6 = vld [vmem:[%s1512_s1 + $0x70] sm:$0xff]  ;;  %v117_v7 = vld [vmem:[%s1512_s1 + $0x78] sm:$0xff]  ;;  %v916_v8 = vpack.c.bf16 %v149_v3, %v148_v2  ;;  %v54_v10 = vld [vmem:[%s1513_s0] sm:$0xff]  ;;  %23 = vst.msk [vmem:[#allocation2 + $0x8] sm:$0xff] %vm21_vm0, %v985_v56 }
  0x12   :  { %873 = vmatprep.subr.bf16.mxu0 %v872_v40  ;;  %v886_v9 = vpack.c.bf16 %v117_v7, %v116_v6  ;;  %v59_v11 = vld [vmem:[%s1513_s0 + $0x28] sm:$0xff]  ;;  %v58_v12 = vld [vmem:[%s1513_s0 + $0x20] sm:$0xff]  ;;  %v57_v14 = vld [vmem:[%s1513_s0 + $0x18] sm:$0xff]  ;;  %24 = vst.msk [vmem:[#allocation2 + $0x10] sm:$0xff] %vm21_vm0, %v985_v56 }
  0x13   :  { %903 = vmatpush3.bf16.msra.mxu1 %v900_v34  ;;  %v62_v13 = vld [vmem:[%s1513_s0 + $0x40] sm:$0xff]  ;;  %v61_v15 = vld [vmem:[%s1513_s0 + $0x38] sm:$0xff]  ;;  %v68_v17 = vld [vmem:[%s1513_s0 + $0x70] sm:$0xff]  ;;  %25 = vst.msk [vmem:[#allocation2 + $0x18] sm:$0xff] %vm21_vm0, %v985_v56 }
  0x14   :  { %905 = vmatprep.subr.bf16.mxu1 %v904_v43  ;;  %v65_v16 = vld [vmem:[%s1513_s0 + $0x58] sm:$0xff]  ;;  %v60_v18 = vld [vmem:[%s1513_s0 + $0x30] sm:$0xff]  ;;  %v71_v20 = vld [vmem:[%s1513_s0 + $0x88] sm:$0xff]  ;;  %26 = vst.msk [vmem:[#allocation2 + $0x20] sm:$0xff] %vm21_vm0, %v985_v56 }
  0x15   :  { %875 = vmatpush3.bf16.msra.mxu0 %v874_v48  ;;  %v64_v19 = vld [vmem:[%s1513_s0 + $0x50] sm:$0xff]  ;;  %v74_v21 = vld [vmem:[%s1513_s0 + $0xa0] sm:$0xff]  ;;  %v63_v22 = vld [vmem:[%s1513_s0 + $0x48] sm:$0xff]  ;;  %27 = vst.msk [vmem:[#allocation2 + $0x28] sm:$0xff] %vm21_vm0, %v985_v56 }
  0x16   :  { %877 = vmatprep.subr.bf16.mxu0 %v876_v51  ;;  %v67_v23 = vld [vmem:[%s1513_s0 + $0x68] sm:$0xff]  ;;  %v77_v24 = vld [vmem:[%s1513_s0 + $0xb8] sm:$0xff]  ;;  %v80_v25 = vld [vmem:[%s1513_s0 + $0xd0] sm:$0xff]  ;;  %28 = vst.msk [vmem:[#allocation2 + $0x30] sm:$0xff] %vm21_vm0, %v985_v56 }
  0x17   :  { %907 = vmatpush3.bf16.msra.mxu1 %v904_v43  ;;  %v66_v26 = vld [vmem:[%s1513_s0 + $0x60] sm:$0xff]  ;;  %v83_v28 = vld [vmem:[%s1513_s0 + $0xe8] sm:$0xff]  ;;  %v69_v30 = vld [vmem:[%s1513_s0 + $0x78] sm:$0xff]  ;;  %29 = vst.msk [vmem:[#allocation2 + $0x38] sm:$0xff] %vm21_vm0, %v985_v56 }
  0x18   :  { %909 = vmatprep.subr.bf16.mxu1 %v908_v54  ;;  %v70_v27 = vld [vmem:[%s1513_s0 + $0x80] sm:$0xff]  ;;  %v73_v31 = vld [vmem:[%s1513_s0 + $0x98] sm:$0xff]  ;;  %v92_v33 = vld [vmem:[%s1513_s0 + $0x130] sm:$0xff]  ;;  %30 = vst.msk [vmem:[#allocation2 + $0x40] sm:$0xff] %vm21_vm0, %v985_v56 }
  0x19   :  { %879 = vmatpush3.bf16.msra.mxu0 %v878_v59  ;;  %v86_v29 = vld [vmem:[%s1513_s0 + $0x100] sm:$0xff]  ;;  %v89_v32 = vld [vmem:[%s1513_s0 + $0x118] sm:$0xff]  ;;  %v72_v34 = vld [vmem:[%s1513_s0 + $0x90] sm:$0xff]  ;;  %31 = vst.msk [vmem:[#allocation2 + $0x48] sm:$0xff] %vm21_vm0, %v985_v56 }
  0x1a   :  { %881 = vmatprep.subr.bf16.mxu0 %v880_v60  ;;  %v76_v35 = vld [vmem:[%s1513_s0 + $0xb0] sm:$0xff]  ;;  %v95_v36 = vld [vmem:[%s1513_s0 + $0x148] sm:$0xff]  ;;  %v98_v37 = vld [vmem:[%s1513_s0 + $0x160] sm:$0xff]  ;;  %32 = vst.msk [vmem:[#allocation2 + $0x50] sm:$0xff] %vm21_vm0, %v985_v56 }
  0x1b   :  { %911 = vmatpush3.bf16.msra.mxu1 %v908_v54  ;;  %v75_v38 = vld [vmem:[%s1513_s0 + $0xa8] sm:$0xff]  ;;  %v101_v40 = vld [vmem:[%s1513_s0 + $0x178] sm:$0xff]  ;;  %v78_v41 = vld [vmem:[%s1513_s0 + $0xc0] sm:$0xff]  ;;  %33 = vst.msk [vmem:[#allocation2 + $0x58] sm:$0xff] %vm21_vm0, %v985_v56 }
  0x1c   :  { %913 = vmatprep.subr.bf16.mxu1 %v912_v63  ;;  %v79_v39 = vld [vmem:[%s1513_s0 + $0xc8] sm:$0xff]  ;;  %v82_v42 = vld [vmem:[%s1513_s0 + $0xe0] sm:$0xff]  ;;  %v81_v43 = vld [vmem:[%s1513_s0 + $0xd8] sm:$0xff]  ;;  %34 = vst.msk [vmem:[#allocation2 + $0x60] sm:$0xff] %vm21_vm0, %v985_v56 }
  0x1d   :  { %883 = vmatpush3.bf16.msra.mxu0 %v882_v4  ;;  %v85_v44 = vld [vmem:[%s1513_s0 + $0xf8] sm:$0xff]  ;;  %v84_v45 = vld [vmem:[%s1513_s0 + $0xf0] sm:$0xff]  ;;  %v87_v47 = vld [vmem:[%s1513_s0 + $0x108] sm:$0xff]  ;;  %35 = vst.msk [vmem:[#allocation2 + $0x68] sm:$0xff] %vm21_vm0, %v985_v56 }
  0x1e   :  { %885 = vmatprep.subr.bf16.mxu0 %v884_v5  ;;  %v88_v46 = vld [vmem:[%s1513_s0 + $0x110] sm:$0xff]  ;;  %v91_v48 = vld [vmem:[%s1513_s0 + $0x128] sm:$0xff]  ;;  %v90_v49 = vld [vmem:[%s1513_s0 + $0x120] sm:$0xff]  ;;  %36 = vst.msk [vmem:[#allocation2 + $0x70] sm:$0xff] %vm21_vm0, %v985_v56 }
  0x1f   :  { %915 = vmatpush3.bf16.msra.mxu1 %v912_v63  ;;  %v94_v50 = vld [vmem:[%s1513_s0 + $0x140] sm:$0xff]  ;;  %v93_v51 = vld [vmem:[%s1513_s0 + $0x138] sm:$0xff]  ;;  %v96_v53 = vld [vmem:[%s1513_s0 + $0x150] sm:$0xff]  ;;  %37 = vst.msk [vmem:[#allocation2 + $0x78] sm:$0xff] %vm21_vm0, %v985_v56 }
  0x20   :  { %917 = vmatprep.subr.bf16.mxu1 %v916_v8  ;;  %v97_v52 = vld [vmem:[%s1513_s0 + $0x158] sm:$0xff]  ;;  %v100_v54 = vld [vmem:[%s1513_s0 + $0x170] sm:$0xff]  ;;  %v99_v55 = vld [vmem:[%s1513_s0 + $0x168] sm:$0xff] }
  0x21   :  { %887 = vmatpush3.bf16.msra.mxu0 %v886_v9  ;;  %v38_v62 = vld [vmem:[#allocation2] sm:$0xff]  ;;  %v39_v6 = vld [vmem:[#allocation2 + $0x8] sm:$0xff] }
  0x23   :  { %919 = vmatpush3.bf16.msra.mxu1 %v916_v8 }
  0x24   :  { %215 = vmatmul.mubr.f32.vlgmr.msra.gmra.mrb[0].mxu0 %v54_v10 }
  0x25   :  { %219 = vmatprep.mubr.f32.mxu0 %v58_v12 }
  0x26   :  { %833 = vmatmul.mubr.f32.vlgmr.msra.gmra.mrb[0].mxu1 %v59_v11 }
  0x27   :  { %835 = vmatprep.mubr.f32.mxu1 %v62_v13 }
  0x28   :  { %220 = vmatmul.mubr.f32.gmra.mrb[2].mxu0 %v57_v14  ;;  %v40_v14 = vld [vmem:[#allocation2 + $0x10] sm:$0xff] }
  0x29   :  { %224 = vmatprep.mubr.f32.mxu0 %v61_v15 }
  0x2a   :  { %836 = vmatmul.mubr.f32.gmra.mrb[2].mxu1 %v65_v16 }
  0x2b   :  { %838 = vmatprep.mubr.f32.mxu1 %v68_v17  ;;  %v1320_v17 = vld [vmem:[%s1514_s2] ss:$0 sm:$0xff] }
  0x2c   :  { %225 = vmatmul.mubr.f32.gmra.mrb[4].mxu0 %v60_v18 }
  0x2d   :  { %229 = vmatprep.mubr.f32.mxu0 %v64_v19 }
  0x2e   :  { %839 = vmatmul.mubr.f32.gmra.mrb[4].mxu1 %v71_v20 }
  0x2f   :  { %841 = vmatprep.mubr.f32.mxu1 %v74_v21 }
  0x30   :  { %230 = vmatmul.mubr.f32.gmra.mrb[6].mxu0 %v63_v22 }
  0x31   :  { %234 = vmatprep.mubr.f32.mxu0 %v67_v23 }
  0x32   :  { %842 = vmatmul.mubr.f32.gmra.mrb[6].mxu1 %v77_v24  ;;  %v1327_v24 = vld [vmem:[%s1515_s3] ss:$0 sm:$0xff] }
  0x33   :  { %844 = vmatprep.mubr.f32.mxu1 %v80_v25  ;;  %v41_v25 = vld [vmem:[#allocation2 + $0x18] sm:$0xff] }
  0x34   :  { %235 = vmatmul.mubr.f32.gmra.mrb[8].mxu0 %v66_v26 }
  0x35   :  { %239 = vmatprep.mubr.f32.mxu0 %v70_v27 }
  0x36   :  { %845 = vmatmul.mubr.f32.gmra.mrb[8].mxu1 %v83_v28 }
  0x37   :  { %847 = vmatprep.mubr.f32.mxu1 %v86_v29 }
  0x38   :  { %240 = vmatmul.mubr.f32.gmra.mrb[10].mxu0 %v69_v30 }
  0x39   :  { %244 = vmatprep.mubr.f32.mxu0 %v73_v31 }
  0x3a   :  { %848 = vmatmul.mubr.f32.gmra.mrb[10].mxu1 %v89_v32 }
  0x3b   :  { %850 = vmatprep.mubr.f32.mxu1 %v92_v33 }
  0x3c   :  { %245 = vmatmul.mubr.f32.gmra.mrb[12].mxu0 %v72_v34 }
  0x3d   :  { %249 = vmatprep.mubr.f32.mxu0 %v76_v35 }
  0x3e   :  { %851 = vmatmul.mubr.f32.gmra.mrb[12].mxu1 %v95_v36  ;;  %v42_v36 = vld [vmem:[#allocation2 + $0x20] sm:$0xff] }
  0x3f   :  { %853 = vmatprep.mubr.f32.mxu1 %v98_v37 }
  0x40   :  { %250 = vmatmul.mubr.f32.gmra.mrb[14].mxu0 %v75_v38 }
  0x41   :  { %254 = vmatprep.mubr.f32.mxu0 %v79_v39 }
  0x42   :  { %854 = vmatmul.mubr.f32.gmra.mrb[14].mxu1 %v101_v40 }
  0x44   :  { %255 = vmatmul.mubr.f32.gmra.mrb[16].mxu0 %v78_v41 }
  0x45   :  { %259 = vmatprep.mubr.f32.mxu0 %v82_v42 }
  0x48   :  { %260 = vmatmul.mubr.f32.gmra.mrb[18].mxu0 %v81_v43 }
  0x49   :  { %264 = vmatprep.mubr.f32.mxu0 %v85_v44 }
  0x4c   :  { %265 = vmatmul.mubr.f32.gmra.mrb[20].mxu0 %v84_v45 }
  0x4d   :  { %269 = vmatprep.mubr.f32.mxu0 %v88_v46 }
  0x50   :  { %270 = vmatmul.mubr.f32.gmra.mrb[22].mxu0 %v87_v47 }
  0x51   :  { %274 = vmatprep.mubr.f32.mxu0 %v91_v48  ;;  %v43_v48 = vld [vmem:[#allocation2 + $0x28] sm:$0xff] }
  0x54   :  { %275 = vmatmul.mubr.f32.gmra.mrb[24].mxu0 %v90_v49 }
  0x55   :  { %279 = vmatprep.mubr.f32.mxu0 %v94_v50 }
  0x58   :  { %280 = vmatmul.mubr.f32.gmra.mrb[26].mxu0 %v93_v51 }
  0x59   :  { %284 = vmatprep.mubr.f32.mxu0 %v97_v52 }
  0x5c   :  { %285 = vmatmul.mubr.f32.gmra.mrb[28].mxu0 %v96_v53 }
  0x5d   :  { %289 = vmatprep.mubr.f32.mxu0 %v100_v54 }
  0x60   :  { %290 = vmatmul.mubr.f32.gmra.mrb[30].mxu0 %v99_v55 }
  0xf7   :  { %v720_v57 = vpop.f32.mrb[0].mxu0 }
  0xf8   :  { %v721_v58 = vpop.f32.mrb[1].mxu0 }
  0xf9   :  { %v834_v59 = vpop.f32.mrb[0].mxu1  ;;  %v722_v60 = vadd.f32 %v721_v58, %v720_v57 }
  0xfa   :  { %v361_v61 = vpop.f32.mrb[1].mxu1 }
  0xfb   :  { %v362_v63 = vadd.f32 %v722_v60, %v361_v61  ;;  %v723_v0 = vpop.f32.mrb[2].mxu0  ;;  %v44_v60 = vld [vmem:[#allocation2 + $0x30] sm:$0xff] }
  0xfc   :  { %v724_v1 = vpop.f32.mrb[3].mxu0 }
  0xfd   :  { %v837_v2 = vpop.f32.mrb[2].mxu1  ;;  %v440_v3 = vadd.f32 %v362_v63, %v38_v62  ;;  %v725_v4 = vadd.f32 %v724_v1, %v723_v0 }
  0xfe   :  { %v371_v5 = vpop.f32.mrb[3].mxu1 }
  0xff   :  { %457 = vst.msk [vmem:[#allocation2] sm:$0xff] %vm21_vm0, %v440_v3  ;;  %v367_v7 = vadd.f32 %v834_v59, %v725_v4  ;;  %v726_v8 = vpop.f32.mrb[4].mxu0 }
 0x100   :  { %v727_v9 = vpop.f32.mrb[5].mxu0 }
 0x101   :  { %v840_v10 = vpop.f32.mrb[4].mxu1  ;;  %v441_v11 = vadd.f32 %v367_v7, %v39_v6  ;;  %v728_v12 = vadd.f32 %v727_v9, %v726_v8  ;;  %v45_v8 = vld [vmem:[#allocation2 + $0x38] sm:$0xff] }
 0x102   :  { %v381_v13 = vpop.f32.mrb[5].mxu1 }
 0x103   :  { %458 = vst.msk [vmem:[#allocation2 + $0x8] sm:$0xff] %vm21_vm0, %v441_v11  ;;  %v372_v15 = vadd.f32 %v728_v12, %v371_v5  ;;  %v729_v16 = vpop.f32.mrb[6].mxu0 }
 0x104   :  { %v730_v18 = vpop.f32.mrb[7].mxu0 }
 0x105   :  { %v1322_v19 = vpop.f32.mrb[6].mxu1  ;;  %v442_v20 = vadd.f32 %v372_v15, %v40_v14  ;;  %v731_v21 = vadd.f32 %v730_v18, %v729_v16 }
 0x106   :  { %v391_v22 = vpop.f32.mrb[7].mxu1  ;;  %v476_v23 = vld [vmem:[#allocation2] sm:$0xff] }
 0x107   :  { %v499_v26 = vmul.f32 %v1320_v17, %v476_v23  ;;  %459 = vst.msk [vmem:[#allocation2 + $0x10] sm:$0xff] %vm21_vm0, %v442_v20  ;;  %v377_v27 = vadd.f32 %v837_v2, %v731_v21  ;;  %v732_v28 = vpop.f32.mrb[8].mxu0 }
 0x108   :  { %v733_v29 = vpop.f32.mrb[9].mxu0 }
 0x109   :  { %v1331_v30 = vpop.f32.mrb[8].mxu1  ;;  %v1334_v31 = vadd.f32 %v1327_v24, %v499_v26  ;;  %v443_v32 = vadd.f32 %v377_v27, %v41_v25  ;;  %v734_v33 = vadd.f32 %v733_v29, %v732_v28 }
 0x10a   :  { %v1336_v34 = vpop.f32.mrb[9].mxu1  ;;  %v477_v35 = vld [vmem:[#allocation2 + $0x8] sm:$0xff] }
 0x10b   :  { %v672_v37 = vmul.f32 -1.442695, %v1334_v31  ;;  %v500_v38 = vmul.f32 %v1320_v17, %v477_v35  ;;  %460 = vst.msk [vmem:[#allocation2 + $0x18] sm:$0xff] %vm21_vm0, %v443_v32  ;;  %v382_v39 = vadd.f32 %v734_v33, %v381_v13  ;;  %v735_v40 = vpop.f32.mrb[10].mxu0 }
 0x10c   :  { %v736_v41 = vpop.f32.mrb[11].mxu0 }
 0x10d   :  { %v1341_v42 = vpop.f32.mrb[10].mxu1  ;;  %921 = vpow2.f32 %v672_v37  ;;  %v1344_v43 = vadd.f32 %v1327_v24, %v500_v38  ;;  %v444_v44 = vadd.f32 %v382_v39, %v42_v36  ;;  %v737_v45 = vadd.f32 %v736_v41, %v735_v40  ;;  %v47_v37 = vld [vmem:[#allocation2 + $0x48] sm:$0xff] }
 0x10e   :  { %v1346_v46 = vpop.f32.mrb[11].mxu1  ;;  %v478_v47 = vld [vmem:[#allocation2 + $0x10] sm:$0xff] }
 0x10f   :  { %v673_v49 = vmul.f32 -1.442695, %v1344_v43  ;;  %v501_v50 = vmul.f32 %v1320_v17, %v478_v47  ;;  %461 = vst.msk [vmem:[#allocation2 + $0x20] sm:$0xff] %vm21_vm0, %v444_v44  ;;  %v387_v51 = vadd.f32 %v840_v10, %v737_v45  ;;  %v738_v52 = vpop.f32.mrb[12].mxu0 }
 0x110   :  { %v739_v53 = vpop.f32.mrb[13].mxu0 }
 0x111   :  { %v1351_v54 = vpop.f32.mrb[12].mxu1  ;;  %923 = vpow2.f32 %v673_v49  ;;  %v1354_v55 = vadd.f32 %v1327_v24, %v501_v50  ;;  %v445_v56 = vadd.f32 %v387_v51, %v43_v48  ;;  %v740_v57 = vadd.f32 %v739_v53, %v738_v52  ;;  %v48_v51 = vld [vmem:[#allocation2 + $0x50] sm:$0xff] }
 0x112   :  { %v1356_v58 = vpop.f32.mrb[13].mxu1  ;;  %v479_v59 = vld [vmem:[#allocation2 + $0x18] sm:$0xff] }
 0x113   :  { %v674_v61 = vmul.f32 -1.442695, %v1354_v55  ;;  %v502_v62 = vmul.f32 %v1320_v17, %v479_v59  ;;  %462 = vst.msk [vmem:[#allocation2 + $0x28] sm:$0xff] %vm21_vm0, %v445_v56  ;;  %v392_v63 = vadd.f32 %v740_v57, %v391_v22  ;;  %v741_v0 = vpop.f32.mrb[14].mxu0  ;;  %v46_v22 = vld [vmem:[#allocation2 + $0x40] sm:$0xff] }
 0x114   :  { %v742_v1 = vpop.f32.mrb[15].mxu0 }
 0x115   :  { %v1361_v2 = vpop.f32.mrb[14].mxu1  ;;  %925 = vpow2.f32 %v674_v61  ;;  %v1364_v3 = vadd.f32 %v1327_v24, %v502_v62  ;;  %v446_v4 = vadd.f32 %v392_v63, %v44_v60  ;;  %v743_v5 = vadd.f32 %v742_v1, %v741_v0 }
 0x116   :  { %v1366_v6 = vpop.f32.mrb[15].mxu1  ;;  %v480_v7 = vld [vmem:[#allocation2 + $0x20] sm:$0xff] }
 0x117   :  { %v922_v9 = vpop.eup %921  ;;  %v675_v10 = vmul.f32 -1.442695, %v1364_v3  ;;  %v503_v11 = vmul.f32 %v1320_v17, %v480_v7  ;;  %463 = vst.msk [vmem:[#allocation2 + $0x30] sm:$0xff] %vm21_vm0, %v446_v4  ;;  %v397_v12 = vadd.f32 %v1322_v19, %v743_v5  ;;  %v744_v13 = vpop.f32.mrb[16].mxu0 }
 0x118   :  { %v586_v14 = vadd.f32 1.0, %v922_v9  ;;  %v745_v15 = vpop.f32.mrb[17].mxu0 }
 0x119   :  { %927 = vpow2.f32 %v675_v10  ;;  %v1373_v16 = vadd.f32 %v1327_v24, %v503_v11  ;;  %v447_v18 = vadd.f32 %v397_v12, %v45_v8  ;;  %v746_v20 = vadd.f32 %v745_v15, %v744_v13 }
 0x11a   :  { %929 = vrcp.f32 %v586_v14  ;;  %v481_v21 = vld [vmem:[#allocation2 + $0x28] sm:$0xff] }
 0x11b   :  { %v924_v23 = vpop.eup %923  ;;  %v676_v25 = vmul.f32 -1.442695, %v1373_v16  ;;  %v504_v26 = vmul.f32 %v1320_v17, %v481_v21  ;;  %464 = vst.msk [vmem:[#allocation2 + $0x38] sm:$0xff] %vm21_vm0, %v447_v18  ;;  %v402_v19 = vadd.f32 %v746_v20, %v1336_v34  ;;  %v747_v27 = vpop.f32.mrb[18].mxu0  ;;  %v50_v21 = vld [vmem:[#allocation2 + $0x60] sm:$0xff] }
 0x11c   :  { %v587_v28 = vadd.f32 1.0, %v924_v23  ;;  %v748_v29 = vpop.f32.mrb[19].mxu0 }
 0x11d   :  { %931 = vpow2.f32 %v676_v25  ;;  %v1380_v32 = vadd.f32 %v1327_v24, %v504_v26  ;;  %v448_v33 = vadd.f32 %v402_v19, %v46_v22  ;;  %v749_v35 = vadd.f32 %v748_v29, %v747_v27 }
 0x11e   :  { %933 = vrcp.f32 %v587_v28  ;;  %v482_v36 = vld [vmem:[#allocation2 + $0x30] sm:$0xff] }
 0x11f   :  { %v926_v38 = vpop.eup %925  ;;  %v677_v39 = vmul.f32 -1.442695, %v1380_v32  ;;  %v505_v40 = vmul.f32 %v1320_v17, %v482_v36  ;;  %465 = vst.msk [vmem:[#allocation2 + $0x40] sm:$0xff] %vm21_vm0, %v448_v33  ;;  %v407_v34 = vadd.f32 %v1331_v30, %v749_v35  ;;  %v750_v41 = vpop.f32.mrb[20].mxu0 }
 0x120   :  { %v588_v44 = vadd.f32 1.0, %v926_v38  ;;  %v751_v45 = vpop.f32.mrb[21].mxu0 }
 0x121   :  { %935 = vpow2.f32 %v677_v39  ;;  %v1387_v47 = vadd.f32 %v1327_v24, %v505_v40  ;;  %v449_v48 = vadd.f32 %v407_v34, %v47_v37  ;;  %v752_v49 = vadd.f32 %v751_v45, %v750_v41 }
 0x122   :  { %937 = vrcp.f32 %v588_v44  ;;  %v483_v50 = vld [vmem:[#allocation2 + $0x38] sm:$0xff] }
 0x123   :  { %v928_v52 = vpop.eup %927  ;;  %v678_v53 = vmul.f32 -1.442695, %v1387_v47  ;;  %v506_v56 = vmul.f32 %v1320_v17, %v483_v50  ;;  %466 = vst.msk [vmem:[#allocation2 + $0x48] sm:$0xff] %vm21_vm0, %v449_v48  ;;  %v412_v30 = vadd.f32 %v752_v49, %v1346_v46  ;;  %v753_v57 = vpop.f32.mrb[22].mxu0 }
 0x124   :  { %v930_v59 = vpop.eup %929  ;;  %v589_v60 = vadd.f32 1.0, %v928_v52  ;;  %v754_v61 = vpop.f32.mrb[23].mxu0 }
 0x125   :  { %v634_v62 = vmul.f32 %v930_v59, %v1334_v31  ;;  %939 = vpow2.f32 %v678_v53  ;;  %v1395_v63 = vadd.f32 %v1327_v24, %v506_v56  ;;  %v450_v0 = vadd.f32 %v412_v30, %v48_v51  ;;  %v49_v31 = vld [vmem:[#allocation2 + $0x58] sm:$0xff]  ;;  %v52_v51 = vld [vmem:[#allocation2 + $0x70] sm:$0xff] }
 0x126   :  { %941 = vrcp.f32 %v589_v60  ;;  %v484_v1 = vld [vmem:[#allocation2 + $0x40] sm:$0xff]  ;;  %v755_v4 = vadd.f32 %v754_v61, %v753_v57 }
 0x127   :  { %v932_v5 = vpop.eup %931  ;;  %650 = vst.msk [vmem:[%s1516_s4] sm:$0xff] %vm21_vm0, %v634_v62  ;;  %v679_v46 = vmul.f32 -1.442695, %v1395_v63  ;;  %v507_v7 = vmul.f32 %v1320_v17, %v484_v1  ;;  %467 = vst.msk [vmem:[#allocation2 + $0x50] sm:$0xff] %vm21_vm0, %v450_v0  ;;  %v756_v8 = vpop.f32.mrb[24].mxu0 }
 0x128   :  { %v934_v9 = vpop.eup %933  ;;  %v590_v10 = vadd.f32 1.0, %v932_v5  ;;  %v417_v11 = vadd.f32 %v1341_v42, %v755_v4  ;;  %v757_v12 = vpop.f32.mrb[25].mxu0  ;;  %v53_v5 = vld [vmem:[#allocation2 + $0x78] sm:$0xff] }
 0x129   :  { %v635_v13 = vmul.f32 %v934_v9, %v1344_v43  ;;  %943 = vpow2.f32 %v679_v46  ;;  %v1407_v14 = vadd.f32 %v1327_v24, %v507_v7  ;;  %v758_v15 = vadd.f32 %v757_v12, %v756_v8 }
 0x12a   :  { %945 = vrcp.f32 %v590_v10  ;;  %v485_v18 = vld [vmem:[#allocation2 + $0x48] sm:$0xff]  ;;  %v451_v20 = vadd.f32 %v417_v11, %v49_v31 }
 0x12b   :  { %v936_v22 = vpop.eup %935  ;;  %651 = vst.msk [vmem:[%s1516_s4 + $0x8] sm:$0xff] %vm21_vm0, %v635_v13  ;;  %v680_v42 = vmul.f32 -1.442695, %v1407_v14  ;;  %v508_v23 = vmul.f32 %v1320_v17, %v485_v18  ;;  %v422_v43 = vadd.f32 %v758_v15, %v1356_v58  ;;  %v759_v25 = vpop.f32.mrb[26].mxu0 }
 0x12c   :  { %v938_v26 = vpop.eup %937  ;;  %v591_v19 = vadd.f32 1.0, %v936_v22  ;;  %468 = vst.msk [vmem:[#allocation2 + $0x58] sm:$0xff] %vm21_vm0, %v451_v20  ;;  %v760_v27 = vpop.f32.mrb[27].mxu0 }
 0x12d   :  { %v636_v28 = vmul.f32 %v938_v26, %v1354_v55  ;;  %947 = vpow2.f32 %v680_v42  ;;  %v1419_v29 = vadd.f32 %v1327_v24, %v508_v23  ;;  %v452_v33 = vadd.f32 %v422_v43, %v50_v21  ;;  %v51_v55 = vld [vmem:[#allocation2 + $0x68] sm:$0xff] }
 0x12e   :  { %949 = vrcp.f32 %v591_v19  ;;  %v486_v35 = vld [vmem:[#allocation2 + $0x50] sm:$0xff]  ;;  %v761_v36 = vadd.f32 %v760_v27, %v759_v25 }
 0x12f   :  { %v940_v37 = vpop.eup %939  ;;  %652 = vst.msk [vmem:[%s1516_s4 + $0x10] sm:$0xff] %vm21_vm0, %v636_v28  ;;  %v681_v58 = vmul.f32 -1.442695, %v1419_v29  ;;  %v509_v38 = vmul.f32 %v1320_v17, %v486_v35  ;;  %469 = vst.msk [vmem:[#allocation2 + $0x60] sm:$0xff] %vm21_vm0, %v452_v33  ;;  %v762_v39 = vpop.f32.mrb[28].mxu0 }
 0x130   :  { %v942_v40 = vpop.eup %941  ;;  %v592_v34 = vadd.f32 1.0, %v940_v37  ;;  %v427_v41 = vadd.f32 %v1351_v54, %v761_v36  ;;  %v763_v44 = vpop.f32.mrb[29].mxu0 }
 0x131   :  { %v637_v45 = vmul.f32 %v942_v40, %v1364_v3  ;;  %951 = vpow2.f32 %v681_v58  ;;  %v1431_v48 = vadd.f32 %v1327_v24, %v509_v38  ;;  %v764_v49 = vadd.f32 %v763_v44, %v762_v39 }
 0x132   :  { %953 = vrcp.f32 %v592_v34  ;;  %v453_v50 = vadd.f32 %v427_v41, %v51_v55 }
 0x133   :  { %v944_v52 = vpop.eup %943  ;;  %653 = vst.msk [vmem:[%s1516_s4 + $0x18] sm:$0xff] %vm21_vm0, %v637_v45  ;;  %v682_v53 = vmul.f32 -1.442695, %v1431_v48  ;;  %v487_v54 = vld [vmem:[#allocation2 + $0x58] sm:$0xff]  ;;  %v432_v56 = vadd.f32 %v764_v49, %v1366_v6  ;;  %v765_v3 = vpop.f32.mrb[30].mxu0 }
 0x134   :  { %v946_v30 = vpop.eup %945  ;;  %v593_v57 = vadd.f32 1.0, %v944_v52  ;;  %v510_v59 = vmul.f32 %v1320_v17, %v487_v54  ;;  %470 = vst.msk [vmem:[#allocation2 + $0x68] sm:$0xff] %vm21_vm0, %v453_v50  ;;  %v766_v60 = vpop.f32.mrb[31].mxu0 }
 0x135   :  { %v638_v61 = vmul.f32 %v946_v30, %v1373_v16  ;;  %955 = vpow2.f32 %v682_v53  ;;  %v454_v62 = vadd.f32 %v432_v56, %v52_v51  ;;  %v767_v0 = vadd.f32 %v766_v60, %v765_v3 }
 0x136   :  { %957 = vrcp.f32 %v593_v57  ;;  %v1443_v1 = vadd.f32 %v1327_v24, %v510_v59  ;;  %v488_v4 = vld [vmem:[#allocation2 + $0x60] sm:$0xff] }
 0x137   :  { %v948_v6 = vpop.eup %947  ;;  %654 = vst.msk [vmem:[%s1516_s4 + $0x20] sm:$0xff] %vm21_vm0, %v638_v61  ;;  %v511_v46 = vmul.f32 %v1320_v17, %v488_v4  ;;  %471 = vst.msk [vmem:[#allocation2 + $0x70] sm:$0xff] %vm21_vm0, %v454_v62  ;;  %v437_v16 = vadd.f32 %v1361_v2, %v767_v0 }
 0x138   :  { %v950_v7 = vpop.eup %949  ;;  %v594_v31 = vadd.f32 1.0, %v948_v6  ;;  %v683_v8 = vmul.f32 -1.442695, %v1443_v1 }
 0x139   :  { %v639_v9 = vmul.f32 %v950_v7, %v1380_v32  ;;  %v534_v10 = vadd.f32 %v1327_v24, %v511_v46  ;;  %v455_v11 = vadd.f32 %v437_v16, %v53_v5 }
 0x13a   :  { %959 = vrcp.f32 %v594_v31 }
 0x13b   :  { %v952_v12 = vpop.eup %951  ;;  %655 = vst.msk [vmem:[%s1516_s4 + $0x28] sm:$0xff] %vm21_vm0, %v639_v9  ;;  %961 = vpow2.f32 %v683_v8  ;;  %v684_v13 = vmul.f32 -1.442695, %v534_v10  ;;  %v489_v15 = vld [vmem:[#allocation2 + $0x68] sm:$0xff]  ;;  %472 = vst.msk [vmem:[#allocation2 + $0x78] sm:$0xff] %vm21_vm0, %v455_v11 }
 0x13c   :  { %v954_v2 = vpop.eup %953  ;;  %v595_v18 = vadd.f32 1.0, %v952_v12  ;;  %v512_v20 = vmul.f32 %v1320_v17, %v489_v15 }
 0x13d   :  { %v640_v32 = vmul.f32 %v954_v2, %v1387_v47  ;;  %963 = vpow2.f32 %v684_v13 }
 0x13e   :  { %965 = vrcp.f32 %v595_v18  ;;  %v535_v21 = vadd.f32 %v1327_v24, %v512_v20  ;;  %v490_v22 = vld [vmem:[#allocation2 + $0x70] sm:$0xff] }
 0x13f   :  { %v956_v42 = vpop.eup %955  ;;  %656 = vst.msk [vmem:[%s1516_s4 + $0x30] sm:$0xff] %vm21_vm0, %v640_v32  ;;  %v513_v23 = vmul.f32 %v1320_v17, %v490_v22 }
 0x140   :  { %v958_v43 = vpop.eup %957  ;;  %v596_v25 = vadd.f32 1.0, %v956_v42  ;;  %v685_v26 = vmul.f32 -1.442695, %v535_v21 }
 0x141   :  { %v641_v19 = vmul.f32 %v958_v43, %v1395_v63  ;;  %v536_v47 = vadd.f32 %v1327_v24, %v513_v23 }
 0x142   :  { %967 = vrcp.f32 %v596_v25  ;;  %v491_v27 = vld [vmem:[#allocation2 + $0x78] sm:$0xff] }
 0x143   :  { %657 = vst.msk [vmem:[%s1516_s4 + $0x38] sm:$0xff] %vm21_vm0, %v641_v19  ;;  %969 = vpow2.f32 %v685_v26  ;;  %v686_v28 = vmul.f32 -1.442695, %v536_v47  ;;  %v514_v33 = vmul.f32 %v1320_v17, %v491_v27 }
 0x144   :  { %v960_v35 = vpop.eup %959 }
 0x145   :  { %v962_v36 = vpop.eup %961  ;;  %v642_v37 = vmul.f32 %v960_v35, %v1407_v14  ;;  %971 = vpow2.f32 %v686_v28  ;;  %v537_v63 = vadd.f32 %v1327_v24, %v514_v33 }
 0x146   :  { %v597_v58 = vadd.f32 1.0, %v962_v36 }
 0x147   :  { %v964_v38 = vpop.eup %963  ;;  %658 = vst.msk [vmem:[%s1516_s4 + $0x40] sm:$0xff] %vm21_vm0, %v642_v37  ;;  %v687_v55 = vmul.f32 -1.442695, %v537_v63 }
 0x148   :  { %v966_v39 = vpop.eup %965  ;;  %973 = vrcp.f32 %v597_v58  ;;  %v598_v40 = vadd.f32 1.0, %v964_v38 }
 0x149   :  { %v643_v17 = vmul.f32 %v966_v39, %v1419_v29  ;;  %975 = vpow2.f32 %v687_v55 }
 0x14a   :  { %977 = vrcp.f32 %v598_v40 }
 0x14b   :  { %659 = vst.msk [vmem:[%s1516_s4 + $0x48] sm:$0xff] %vm21_vm0, %v643_v17 }
 0x14c   :  { %v968_v24 = vpop.eup %967 }
 0x14d   :  { %v970_v14 = vpop.eup %969  ;;  %v644_v34 = vmul.f32 %v968_v24, %v1431_v48 }
 0x14e   :  { %v599_v41 = vadd.f32 1.0, %v970_v14 }
 0x14f   :  { %v972_v44 = vpop.eup %971  ;;  %660 = vst.msk [vmem:[%s1516_s4 + $0x50] sm:$0xff] %vm21_vm0, %v644_v34 }
 0x150   :  { %979 = vrcp.f32 %v599_v41  ;;  %v600_v29 = vadd.f32 1.0, %v972_v44 }
 0x152   :  { %v974_v45 = vpop.eup %973  ;;  %981 = vrcp.f32 %v600_v29 }
 0x153   :  { %v976_v49 = vpop.eup %975  ;;  %v645_v50 = vmul.f32 %v974_v45, %v1443_v1 }
 0x154   :  { %v978_v51 = vpop.eup %977  ;;  %v601_v52 = vadd.f32 1.0, %v976_v49 }
 0x155   :  { %661 = vst.msk [vmem:[%s1516_s4 + $0x58] sm:$0xff] %vm21_vm0, %v645_v50  ;;  %v646_v48 = vmul.f32 %v978_v51, %v534_v10 }
 0x156   :  { %983 = vrcp.f32 %v601_v52 }
 0x157   :  { %662 = vst.msk [vmem:[%s1516_s4 + $0x60] sm:$0xff] %vm21_vm0, %v646_v48 }
 0x15a   :  { %v980_v53 = vpop.eup %979 }
 0x15b   :  { %v647_v54 = vmul.f32 %v980_v53, %v535_v21 }
 0x15c   :  { %v982_v56 = vpop.eup %981 }
 0x15d   :  { %663 = vst.msk [vmem:[%s1516_s4 + $0x68] sm:$0xff] %vm21_vm0, %v647_v54  ;;  %v648_v3 = vmul.f32 %v982_v56, %v536_v47 }
 0x15f   :  { %664 = vst.msk [vmem:[%s1516_s4 + $0x70] sm:$0xff] %vm21_vm0, %v648_v3 }
 0x160   :  { %v984_v30 = vpop.eup %983 }
 0x161   :  { %v649_v57 = vmul.f32 %v984_v30, %v537_v63 }
 0x163   :  { %665 = vst.msk [vmem:[%s1516_s4 + $0x78] sm:$0xff] %vm21_vm0, %v649_v57 }

</bundles_post_ra>
